<compile_context>
chip_gen: v5e
topology: v5e:2x2
jax: 0.10.0
libtpu: 0.0.40
codegen_flags: <defaults>
</compile_context>

<pallas_src>
import functools

import jax
import jax.numpy as jnp
from jax.experimental import pallas as pl
from jax.experimental.pallas import tpu as pltpu


def _mha_kernel(q_ref, k_ref, v_ref, wq_ref, wk_ref, wv_ref, o_ref, *, heads):
    """One (batch, q-tile) step: fused lane-dense QKV projection + attention.

    q_ref: (tq, E), k_ref/v_ref: (Lk, E), w*_ref: (E, E) block-diagonal
    (scale already folded into wq), o_ref: (tq, E).
    """
    E = q_ref.shape[-1]
    D = E // heads

    # Lane-dense projections over the full E width (block-diag weights encode
    # the shared per-head (D, D) Linear layers; 1/sqrt(E) folded into wq).
    q = jnp.dot(q_ref[...], wq_ref[...], preferred_element_type=jnp.float32)
    k = jnp.dot(k_ref[...], wk_ref[...], preferred_element_type=jnp.float32)
    v = jnp.dot(v_ref[...], wv_ref[...], preferred_element_type=jnp.float32)

    outs = []
    for h in range(heads):  # static unroll; head count is small
        lo = h * D
        qh = q[:, lo:lo + D]
        kh = k[:, lo:lo + D]
        vh = v[:, lo:lo + D]

        # scores[q, k] = <qh_q, kh_k> (scale already in qh)
        s = jax.lax.dot_general(qh, kh, (((1,), (1,)), ((), ())),
                                preferred_element_type=jnp.float32)

        # softmax over the key axis (EUP reciprocal instead of VALU divide)
        m = jnp.max(s, axis=-1, keepdims=True)
        p = jnp.exp(s - m)
        denom = jnp.sum(p, axis=-1, keepdims=True)
        attn = p * pl.reciprocal(denom, approx=True)

        outs.append(jnp.dot(attn, vh, preferred_element_type=jnp.float32))

    # Single lane-dense (tq, E) store of the concatenated heads.
    o_ref[...] = jnp.concatenate(outs, axis=-1).astype(o_ref.dtype)


def _fc_out_kernel(x_ref, w_ref, b_ref, o_ref):
    y = jnp.dot(x_ref[...], w_ref[...], preferred_element_type=jnp.float32)
    o_ref[...] = (y + b_ref[...]).astype(o_ref.dtype)


def multi_head_attention(values, keys, query, params, heads):
    """Pallas forward pass matching MultiHeadAttention.forward."""
    N, Lq, E = query.shape
    Lk = keys.shape[1]
    Lv = values.shape[1]
    D = E // heads
    assert D * heads == E
    assert Lk == Lv  # required by the einsum contraction in the reference

    dtype = params["wq"].dtype
    scale = 1.0 / (float(E) ** 0.5)

    # PyTorch Linear stores weight as (out, in): y = x @ W.T.  Expand the
    # shared per-head weights to block-diagonal (E, E) so the projection acts
    # directly on the lane-packed (rows, E) layout with no head transposes.
    eye_h = jnp.eye(heads, dtype=dtype)
    wq_big = jnp.kron(eye_h, params["wq"].T) * jnp.asarray(scale, dtype)
    wk_big = jnp.kron(eye_h, params["wk"].T)
    wv_big = jnp.kron(eye_h, params["wv"].T)

    # Tile the query sequence axis (full block if small; 512 rows otherwise).
    tq = Lq if Lq <= 512 else 512
    n_q_tiles = pl.cdiv(Lq, tq)

    head_out = pl.pallas_call(
        functools.partial(_mha_kernel, heads=heads),
        out_shape=jax.ShapeDtypeStruct((N, Lq, E), query.dtype),
        grid=(N, n_q_tiles),
        in_specs=[
            pl.BlockSpec((None, tq, E), lambda n, i: (n, i, 0)),
            pl.BlockSpec((None, Lk, E), lambda n, i: (n, 0, 0)),
            pl.BlockSpec((None, Lv, E), lambda n, i: (n, 0, 0)),
            pl.BlockSpec((E, E), lambda n, i: (0, 0)),
            pl.BlockSpec((E, E), lambda n, i: (0, 0)),
            pl.BlockSpec((E, E), lambda n, i: (0, 0)),
        ],
        out_specs=pl.BlockSpec((None, tq, E), lambda n, i: (n, i, 0)),
        compiler_params=pltpu.CompilerParams(
            dimension_semantics=("parallel", "parallel"),
            vmem_limit_bytes=32 * 1024 * 1024),
    )(query, keys, values, wq_big, wk_big, wv_big)

    # Heads are already packed in the lane axis in the reference's [h, d]
    # order, so this reshape is layout-free (no transpose).
    NL = N * Lq
    x2d = head_out.reshape(NL, E)

    wo_t = params["wo"].T
    bo = params["bo"].reshape(1, E)

    tm = NL if NL <= 512 else 512
    n_m_tiles = pl.cdiv(NL, tm)

    out2d = pl.pallas_call(
        _fc_out_kernel,
        out_shape=jax.ShapeDtypeStruct((NL, E), query.dtype),
        grid=(n_m_tiles,),
        in_specs=[
            pl.BlockSpec((tm, E), lambda i: (i, 0)),
            pl.BlockSpec((E, E), lambda i: (0, 0)),
            pl.BlockSpec((1, E), lambda i: (0, 0)),
        ],
        out_specs=pl.BlockSpec((tm, E), lambda i: (i, 0)),
        compiler_params=pltpu.CompilerParams(
            dimension_semantics=("parallel",),
            vmem_limit_bytes=32 * 1024 * 1024),
    )(x2d, wo_t, bo)

    return out2d.reshape(N, Lq, E)


def reference_mha(values, keys, query, params, heads):
    """Pure-JAX reference reproducing the PyTorch forward exactly."""
    N, _, E = query.shape
    D = E // heads
    v = values.reshape(N, -1, heads, D)
    k = keys.reshape(N, -1, heads, D)
    q = query.reshape(N, -1, heads, D)
    v = jnp.einsum("nlhd,ed->nlhe", v, params["wv"])
    k = jnp.einsum("nlhd,ed->nlhe", k, params["wk"])
    q = jnp.einsum("nlhd,ed->nlhe", q, params["wq"])
    energy = jnp.einsum("nqhd,nkhd->nhqk", q, k)
    attn = jax.nn.softmax(energy / (float(E) ** 0.5), axis=3)
    out = jnp.einsum("nhql,nlhd->nqhd", attn, v).reshape(N, -1, heads * D)
    out = jnp.einsum("nqe,fe->nqf", out, params["wo"]) + params["bo"]
    return out


def init_params(key, embed_size, heads, dtype=jnp.float32):
    """Deterministic init matching PyTorch Linear default (uniform +-1/sqrt(fan_in))."""
    D = embed_size // heads
    k1, k2, k3, k4, k5 = jax.random.split(key, 5)
    lim_d = 1.0 / (D ** 0.5)
    lim_e = 1.0 / (embed_size ** 0.5)
    return {
        "wq": jax.random.uniform(k1, (D, D), dtype, -lim_d, lim_d),
        "wk": jax.random.uniform(k2, (D, D), dtype, -lim_d, lim_d),
        "wv": jax.random.uniform(k3, (D, D), dtype, -lim_d, lim_d),
        "wo": jax.random.uniform(k4, (embed_size, embed_size), dtype,
                                 -lim_e, lim_e),
        "bo": jax.random.uniform(k5, (embed_size,), dtype, -lim_e, lim_e),
    }


if __name__ == "__main__":
    embed_size = 32
    heads = 4
    N = 2
    L = 8

    key = jax.random.PRNGKey(0)
    kp, kv, kk, kq = jax.random.split(key, 4)
    params = init_params(kp, embed_size, heads)

    values = jax.random.normal(kv, (N, L, embed_size), jnp.float32)
    keys = jax.random.normal(kk, (N, L, embed_size), jnp.float32)
    query = jax.random.normal(kq, (N, L, embed_size), jnp.float32)

    out = multi_head_attention(values, keys, query, params, heads)
    out = jax.block_until_ready(out)

    ref = reference_mha(values, keys, query, params, heads)
    assert out.shape == (N, L, embed_size)
    # Tolerance is slightly loosened because the softmax denominator uses the
    # EUP approximate reciprocal (pl.reciprocal(approx=True)).
    assert jnp.allclose(out, ref, atol=2e-3, rtol=2e-3), "mismatch vs reference"

    print("KERNEL_OK")
</pallas_src>

<mosaic_0001>
module attributes {stable_mosaic.version = 11 : i64} {
  func.func @_mha_kernel(%arg0: i32, %arg1: i32, %arg2: memref<1x8x32xf32, #tpu.memory_space<vmem>>, %arg3: memref<1x8x32xf32, #tpu.memory_space<vmem>>, %arg4: memref<1x8x32xf32, #tpu.memory_space<vmem>>, %arg5: memref<32x32xf32, #tpu.memory_space<vmem>>, %arg6: memref<32x32xf32, #tpu.memory_space<vmem>>, %arg7: memref<32x32xf32, #tpu.memory_space<vmem>>, %arg8: memref<1x8x32xf32, #tpu.memory_space<vmem>>) attributes {dimension_semantics = [#tpu.dimension_semantics<parallel>, #tpu.dimension_semantics<parallel>], iteration_bounds = array<i64: 2, 1>, scalar_prefetch = 0 : i64, scratch_operands = 0 : i64, tpu.core_type = #tpu.core_type<tc>, window_params = [{transform_indices = @transform_0, window_bounds = array<i64: 1, 8, 32>}, {transform_indices = @transform_1, window_bounds = array<i64: 1, 8, 32>}, {transform_indices = @transform_2, window_bounds = array<i64: 1, 8, 32>}, {pipeline_mode = #tpu.pipeline_mode<synchronous>, transform_indices = @transform_3, window_bounds = array<i64: 32, 32>}, {pipeline_mode = #tpu.pipeline_mode<synchronous>, transform_indices = @transform_4, window_bounds = array<i64: 32, 32>}, {pipeline_mode = #tpu.pipeline_mode<synchronous>, transform_indices = @transform_5, window_bounds = array<i64: 32, 32>}, {transform_indices = @transform_6, window_bounds = array<i64: 1, 8, 32>}]} {
    %c0 = arith.constant 0 : index
    %c0_0 = arith.constant 0 : index
    %c0_1 = arith.constant 0 : index
    %0 = vector.load %arg2[%c0, %c0_0, %c0_1] : memref<1x8x32xf32, #tpu.memory_space<vmem>>, vector<1x8x32xf32>
    %1 = vector.shape_cast %0 : vector<1x8x32xf32> to vector<8x32xf32>
    %c0_2 = arith.constant 0 : index
    %c0_3 = arith.constant 0 : index
    %2 = vector.load %arg5[%c0_2, %c0_3] : memref<32x32xf32, #tpu.memory_space<vmem>>, vector<32x32xf32>
    %cst = arith.constant dense<0.000000e+00> : vector<8x32xf32>
    %3 = tpu.matmul %1, %2, %cst {dimension_numbers = #tpu.dot_dimension_numbers<[1], [0], [0], [1], [0, 0, 1, 1], [], []>} : vector<8x32xf32>, vector<32x32xf32>, vector<8x32xf32> -> vector<8x32xf32>
    %c0_4 = arith.constant 0 : index
    %c0_5 = arith.constant 0 : index
    %c0_6 = arith.constant 0 : index
    %4 = vector.load %arg3[%c0_4, %c0_5, %c0_6] : memref<1x8x32xf32, #tpu.memory_space<vmem>>, vector<1x8x32xf32>
    %5 = vector.shape_cast %4 : vector<1x8x32xf32> to vector<8x32xf32>
    %c0_7 = arith.constant 0 : index
    %c0_8 = arith.constant 0 : index
    %6 = vector.load %arg6[%c0_7, %c0_8] : memref<32x32xf32, #tpu.memory_space<vmem>>, vector<32x32xf32>
    %cst_9 = arith.constant dense<0.000000e+00> : vector<8x32xf32>
    %7 = tpu.matmul %5, %6, %cst_9 {dimension_numbers = #tpu.dot_dimension_numbers<[1], [0], [0], [1], [0, 0, 1, 1], [], []>} : vector<8x32xf32>, vector<32x32xf32>, vector<8x32xf32> -> vector<8x32xf32>
    %c0_10 = arith.constant 0 : index
    %c0_11 = arith.constant 0 : index
    %c0_12 = arith.constant 0 : index
    %8 = vector.load %arg4[%c0_10, %c0_11, %c0_12] : memref<1x8x32xf32, #tpu.memory_space<vmem>>, vector<1x8x32xf32>
    %9 = vector.shape_cast %8 : vector<1x8x32xf32> to vector<8x32xf32>
    %c0_13 = arith.constant 0 : index
    %c0_14 = arith.constant 0 : index
    %10 = vector.load %arg7[%c0_13, %c0_14] : memref<32x32xf32, #tpu.memory_space<vmem>>, vector<32x32xf32>
    %cst_15 = arith.constant dense<0.000000e+00> : vector<8x32xf32>
    %11 = tpu.matmul %9, %10, %cst_15 {dimension_numbers = #tpu.dot_dimension_numbers<[1], [0], [0], [1], [0, 0, 1, 1], [], []>} : vector<8x32xf32>, vector<32x32xf32>, vector<8x32xf32> -> vector<8x32xf32>
    %12 = vector.extract_strided_slice %3 {offsets = [0, 0], sizes = [8, 8], strides = [1, 1]} : vector<8x32xf32> to vector<8x8xf32>
    %13 = vector.extract_strided_slice %7 {offsets = [0, 0], sizes = [8, 8], strides = [1, 1]} : vector<8x32xf32> to vector<8x8xf32>
    %14 = vector.extract_strided_slice %11 {offsets = [0, 0], sizes = [8, 8], strides = [1, 1]} : vector<8x32xf32> to vector<8x8xf32>
    %cst_16 = arith.constant dense<0.000000e+00> : vector<8x8xf32>
    %15 = tpu.matmul %12, %13, %cst_16 {dimension_numbers = #tpu.dot_dimension_numbers<[1], [1], [0], [0], [0, 0, 1, 0], [], []>} : vector<8x8xf32>, vector<8x8xf32>, vector<8x8xf32> -> vector<8x8xf32>
    %cst_17 = arith.constant dense<0xFF800000> : vector<8xf32>
    %16 = vector.multi_reduction <maximumf>, %15, %cst_17 [1] : vector<8x8xf32> to vector<8xf32>
    %17 = vector.shape_cast %16 : vector<8xf32> to vector<8x1xf32>
    %18 = vector.broadcast %17 : vector<8x1xf32> to vector<8x8xf32>
    %19 = arith.subf %15, %18 : vector<8x8xf32>
    %20 = math.exp %19 : vector<8x8xf32>
    %cst_18 = arith.constant dense<0.000000e+00> : vector<8xf32>
    %21 = vector.multi_reduction <add>, %20, %cst_18 [1] : vector<8x8xf32> to vector<8xf32>
    %22 = vector.shape_cast %21 : vector<8xf32> to vector<8x1xf32>
    %23 = tpu.reciprocal %22 {approx = true} : vector<8x1xf32> -> vector<8x1xf32>
    %24 = vector.broadcast %23 : vector<8x1xf32> to vector<8x8xf32>
    %25 = arith.mulf %20, %24 : vector<8x8xf32>
    %cst_19 = arith.constant dense<0.000000e+00> : vector<8x8xf32>
    %26 = tpu.matmul %25, %14, %cst_19 {dimension_numbers = #tpu.dot_dimension_numbers<[1], [0], [0], [1], [0, 0, 1, 1], [], []>} : vector<8x8xf32>, vector<8x8xf32>, vector<8x8xf32> -> vector<8x8xf32>
    %27 = vector.extract_strided_slice %3 {offsets = [0, 8], sizes = [8, 8], strides = [1, 1]} : vector<8x32xf32> to vector<8x8xf32>
    %28 = vector.extract_strided_slice %7 {offsets = [0, 8], sizes = [8, 8], strides = [1, 1]} : vector<8x32xf32> to vector<8x8xf32>
    %29 = vector.extract_strided_slice %11 {offsets = [0, 8], sizes = [8, 8], strides = [1, 1]} : vector<8x32xf32> to vector<8x8xf32>
    %cst_20 = arith.constant dense<0.000000e+00> : vector<8x8xf32>
    %30 = tpu.matmul %27, %28, %cst_20 {dimension_numbers = #tpu.dot_dimension_numbers<[1], [1], [0], [0], [0, 0, 1, 0], [], []>} : vector<8x8xf32>, vector<8x8xf32>, vector<8x8xf32> -> vector<8x8xf32>
    %cst_21 = arith.constant dense<0xFF800000> : vector<8xf32>
    %31 = vector.multi_reduction <maximumf>, %30, %cst_21 [1] : vector<8x8xf32> to vector<8xf32>
    %32 = vector.shape_cast %31 : vector<8xf32> to vector<8x1xf32>
    %33 = vector.broadcast %32 : vector<8x1xf32> to vector<8x8xf32>
    %34 = arith.subf %30, %33 : vector<8x8xf32>
    %35 = math.exp %34 : vector<8x8xf32>
    %cst_22 = arith.constant dense<0.000000e+00> : vector<8xf32>
    %36 = vector.multi_reduction <add>, %35, %cst_22 [1] : vector<8x8xf32> to vector<8xf32>
    %37 = vector.shape_cast %36 : vector<8xf32> to vector<8x1xf32>
    %38 = tpu.reciprocal %37 {approx = true} : vector<8x1xf32> -> vector<8x1xf32>
    %39 = vector.broadcast %38 : vector<8x1xf32> to vector<8x8xf32>
    %40 = arith.mulf %35, %39 : vector<8x8xf32>
    %cst_23 = arith.constant dense<0.000000e+00> : vector<8x8xf32>
    %41 = tpu.matmul %40, %29, %cst_23 {dimension_numbers = #tpu.dot_dimension_numbers<[1], [0], [0], [1], [0, 0, 1, 1], [], []>} : vector<8x8xf32>, vector<8x8xf32>, vector<8x8xf32> -> vector<8x8xf32>
    %42 = vector.extract_strided_slice %3 {offsets = [0, 16], sizes = [8, 8], strides = [1, 1]} : vector<8x32xf32> to vector<8x8xf32>
    %43 = vector.extract_strided_slice %7 {offsets = [0, 16], sizes = [8, 8], strides = [1, 1]} : vector<8x32xf32> to vector<8x8xf32>
    %44 = vector.extract_strided_slice %11 {offsets = [0, 16], sizes = [8, 8], strides = [1, 1]} : vector<8x32xf32> to vector<8x8xf32>
    %cst_24 = arith.constant dense<0.000000e+00> : vector<8x8xf32>
    %45 = tpu.matmul %42, %43, %cst_24 {dimension_numbers = #tpu.dot_dimension_numbers<[1], [1], [0], [0], [0, 0, 1, 0], [], []>} : vector<8x8xf32>, vector<8x8xf32>, vector<8x8xf32> -> vector<8x8xf32>
    %cst_25 = arith.constant dense<0xFF800000> : vector<8xf32>
    %46 = vector.multi_reduction <maximumf>, %45, %cst_25 [1] : vector<8x8xf32> to vector<8xf32>
    %47 = vector.shape_cast %46 : vector<8xf32> to vector<8x1xf32>
    %48 = vector.broadcast %47 : vector<8x1xf32> to vector<8x8xf32>
    %49 = arith.subf %45, %48 : vector<8x8xf32>
    %50 = math.exp %49 : vector<8x8xf32>
    %cst_26 = arith.constant dense<0.000000e+00> : vector<8xf32>
    %51 = vector.multi_reduction <add>, %50, %cst_26 [1] : vector<8x8xf32> to vector<8xf32>
    %52 = vector.shape_cast %51 : vector<8xf32> to vector<8x1xf32>
    %53 = tpu.reciprocal %52 {approx = true} : vector<8x1xf32> -> vector<8x1xf32>
    %54 = vector.broadcast %53 : vector<8x1xf32> to vector<8x8xf32>
    %55 = arith.mulf %50, %54 : vector<8x8xf32>
    %cst_27 = arith.constant dense<0.000000e+00> : vector<8x8xf32>
    %56 = tpu.matmul %55, %44, %cst_27 {dimension_numbers = #tpu.dot_dimension_numbers<[1], [0], [0], [1], [0, 0, 1, 1], [], []>} : vector<8x8xf32>, vector<8x8xf32>, vector<8x8xf32> -> vector<8x8xf32>
    %57 = vector.extract_strided_slice %3 {offsets = [0, 24], sizes = [8, 8], strides = [1, 1]} : vector<8x32xf32> to vector<8x8xf32>
    %58 = vector.extract_strided_slice %7 {offsets = [0, 24], sizes = [8, 8], strides = [1, 1]} : vector<8x32xf32> to vector<8x8xf32>
    %59 = vector.extract_strided_slice %11 {offsets = [0, 24], sizes = [8, 8], strides = [1, 1]} : vector<8x32xf32> to vector<8x8xf32>
    %cst_28 = arith.constant dense<0.000000e+00> : vector<8x8xf32>
    %60 = tpu.matmul %57, %58, %cst_28 {dimension_numbers = #tpu.dot_dimension_numbers<[1], [1], [0], [0], [0, 0, 1, 0], [], []>} : vector<8x8xf32>, vector<8x8xf32>, vector<8x8xf32> -> vector<8x8xf32>
    %cst_29 = arith.constant dense<0xFF800000> : vector<8xf32>
    %61 = vector.multi_reduction <maximumf>, %60, %cst_29 [1] : vector<8x8xf32> to vector<8xf32>
    %62 = vector.shape_cast %61 : vector<8xf32> to vector<8x1xf32>
    %63 = vector.broadcast %62 : vector<8x1xf32> to vector<8x8xf32>
    %64 = arith.subf %60, %63 : vector<8x8xf32>
    %65 = math.exp %64 : vector<8x8xf32>
    %cst_30 = arith.constant dense<0.000000e+00> : vector<8xf32>
    %66 = vector.multi_reduction <add>, %65, %cst_30 [1] : vector<8x8xf32> to vector<8xf32>
    %67 = vector.shape_cast %66 : vector<8xf32> to vector<8x1xf32>
    %68 = tpu.reciprocal %67 {approx = true} : vector<8x1xf32> -> vector<8x1xf32>
    %69 = vector.broadcast %68 : vector<8x1xf32> to vector<8x8xf32>
    %70 = arith.mulf %65, %69 : vector<8x8xf32>
    %cst_31 = arith.constant dense<0.000000e+00> : vector<8x8xf32>
    %71 = tpu.matmul %70, %59, %cst_31 {dimension_numbers = #tpu.dot_dimension_numbers<[1], [0], [0], [1], [0, 0, 1, 1], [], []>} : vector<8x8xf32>, vector<8x8xf32>, vector<8x8xf32> -> vector<8x8xf32>
    %72 = tpu.concatenate %26, %41, %56, %71 in 1 : vector<8x8xf32>, vector<8x8xf32>, vector<8x8xf32>, vector<8x8xf32> -> vector<8x32xf32>
    %c0_32 = arith.constant 0 : index
    %c0_33 = arith.constant 0 : index
    %c0_34 = arith.constant 0 : index
    %73 = vector.load %arg8[%c0_32, %c0_33, %c0_34] : memref<1x8x32xf32, #tpu.memory_space<vmem>>, vector<1x8x32xf32>
    %74 = vector.shape_cast %73 : vector<1x8x32xf32> to vector<8x32xf32>
    %75 = vector.shape_cast %72 : vector<8x32xf32> to vector<1x8x32xf32>
    tpu.vector_store %arg8[%c0_32, %c0_33, %c0_34], %75 {strides = array<i32>} : memref<1x8x32xf32, #tpu.memory_space<vmem>>, vector<1x8x32xf32>,
    return
  }
  func.func @transform_0(%arg0: i32, %arg1: i32) -> (i32, i32, i32) {
    %c0_i32 = arith.constant 0 : i32
    %c0_i32_0 = arith.constant 0 : i32
    return %arg0, %arg1, %c0_i32 : i32, i32, i32
  }
  func.func @transform_1(%arg0: i32, %arg1: i32) -> (i32, i32, i32) {
    %c0_i32 = arith.constant 0 : i32
    %c0_i32_0 = arith.constant 0 : i32
    %c0_i32_1 = arith.constant 0 : i32
    return %arg0, %c0_i32, %c0_i32_0 : i32, i32, i32
  }
  func.func @transform_2(%arg0: i32, %arg1: i32) -> (i32, i32, i32) {
    %c0_i32 = arith.constant 0 : i32
    %c0_i32_0 = arith.constant 0 : i32
    %c0_i32_1 = arith.constant 0 : i32
    return %arg0, %c0_i32, %c0_i32_0 : i32, i32, i32
  }
  func.func @transform_3(%arg0: i32, %arg1: i32) -> (i32, i32) {
    %c0_i32 = arith.constant 0 : i32
    %c0_i32_0 = arith.constant 0 : i32
    %c0_i32_1 = arith.constant 0 : i32
    return %c0_i32, %c0_i32_0 : i32, i32
  }
  func.func @transform_4(%arg0: i32, %arg1: i32) -> (i32, i32) {
    %c0_i32 = arith.constant 0 : i32
    %c0_i32_0 = arith.constant 0 : i32
    %c0_i32_1 = arith.constant 0 : i32
    return %c0_i32, %c0_i32_0 : i32, i32
  }
  func.func @transform_5(%arg0: i32, %arg1: i32) -> (i32, i32) {
    %c0_i32 = arith.constant 0 : i32
    %c0_i32_0 = arith.constant 0 : i32
    %c0_i32_1 = arith.constant 0 : i32
    return %c0_i32, %c0_i32_0 : i32, i32
  }
  func.func @transform_6(%arg0: i32, %arg1: i32) -> (i32, i32, i32) {
    %c0_i32 = arith.constant 0 : i32
    %c0_i32_0 = arith.constant 0 : i32
    return %arg0, %arg1, %c0_i32 : i32, i32, i32
  }
}

</mosaic_0001>

<bundles_post_ra>
// kernel: tpu_custom_call.1
= control target key start
LH: loop header
LB: loop body
LE: loop exit
PB: predicated region body
PF: predicated region fallthrough
CT: control target
= control target key end

     0   :  { %s1683_s0 = inlined_call_operand.hbm [shape: f32[2,8,32], index: 0, kind: input, shape index: {}]   ;;  %s1684_s1 = inlined_call_operand.hbm [shape: f32[2,8,32], index: 1, kind: input, shape index: {}]   ;;  %s1685_s2 = inlined_call_operand.hbm [shape: f32[2,8,32], index: 2, kind: input, shape index: {}]   ;;  %s1686_s3 = inlined_call_operand.hbm [shape: f32[32,32], index: 3, kind: input, shape index: {}]   ;;  %s1687_s4 = inlined_call_operand.hbm [shape: f32[32,32], index: 4, kind: input, shape index: {}]   ;;  %s1688_s5 = inlined_call_operand.hbm [shape: f32[32,32], index: 5, kind: input, shape index: {}]   ;;  %s1689_s6 = inlined_call_operand.hbm [shape: f32[2,8,32], index: 6, kind: output, shape index: {}]  }
   0x1   :  { %1701 = sst [smem:[#allocation25_spill]] %s1684_s1 }
   0x2   :  { %1702 = sst [smem:[#allocation26_spill]] %s1686_s3 }
   0x3   :  { %1703 = sst [smem:[#allocation27_spill]] %s1687_s4 }
   0x4   :  { %1704 = sst [smem:[#allocation28_spill]] %s1688_s5 }
   0x5   :  { %11 = vsyncpa [#allocation3], 0 }
   0x6   :  { %13 = vsyncpa [#allocation3 + $0x1], 0 }
   0x7   :  { %14 = vsyncpa [#allocation6], 0 }
   0x8   :  { %16 = vsyncpa [#allocation6 + $0x1], 0 }
   0x9   :  { %17 = vsyncpa [#allocation9], 0 }
   0xa   :  { %18 = vsyncpa [#allocation12], 0 }
   0xb   :  { %19 = vsyncpa [#allocation4], 0 }
   0xc   :  { %21 = vsyncpa [#allocation4 + $0x1], 0  ;;  %s1429_s21 = smov 0   ;;  %s1431_s22 = smov 0  }
   0xd   :  { %s1433_s23 = smov 0   ;;  %s1435_s24 = smov 0  }
   0xe   :  { %s1437_s25 = smov 0   ;;  %s1439_s26 = smov 0  }
   0xf LB: > { %1705 = sst [smem:[#allocation19_spill]] %s1361_s21  ;;  %s1460_s27 = sadd.s32 4294967295, %s1381_s26   ;;  %s1381_s26 = sphi %s1439_s26, %s27_s26   ;;  %s1377_s25 = sphi %s1437_s25, %s1730_s25   ;;  %s1373_s24 = sphi %s1435_s24, %s1729_s24   ;;  %s1369_s23 = sphi %s1433_s23, %s1733_s23   ;;  %s1365_s22 = sphi %s1431_s22, %s1732_s22   ;;  %s1361_s21 = sphi %s1429_s21, %s1731_s21  }
  0x10   : > { %1706 = sst [smem:[#allocation20_spill]] %s1377_s25  ;;  %p942_p0 = scmp.ge.s32.totalorder %s1381_s26, 1 }
  0x11   : > { %1707 = sst [smem:[#allocation21_spill]] %s1381_s26  ;;  %p62_p1 = scmp.eq.s32.totalorder %s1460_s27, 0 }
  0x12   : > { %p215_p2 = scmp.lt.s32.totalorder %s1381_s26, 3  ;;  %s1708_s3 = sld [smem:[#allocation26_spill]] }
  0x13   : > { %s1383_s8 = smov [#allocation8]   ;;  %p946_p6 = scmp.ge.s32.totalorder %s1381_s26, 2 }
  0x14   : > { %p1468_p3 = pnand %p942_p0, %p215_p2  ;;  %s228_s9 = sshll.u32 %s1383_s8, 4  ;;  %s229_s9 = int_to_ptr.vmem [resolvable:$true] %s228_s9 }
  0x15   : > { %s1690_s11 = smov 128   ;;  %s1692_s12 = smov 8  }
  0x16   : > { %p1000_p4 = pneg %p1468_p3  ;;  %s941_s13 = sadd.s32 4294967294, %s1381_s26  }
  0x17   : > { %s39_s14 = sadd.s32 1, %s1377_s25  ;;  %s48_s15 = sadd.s32 1, %s1369_s23 }
  0x18   : > { %s226_s30 = sshll.u32 %s1708_s3, 4  ;;  %p1476_p5 = pnand %p1000_p4, %p62_p1  ;;  %s227_s30 = int_to_ptr.hbm [resolvable:$true] %s226_s30 }
  0x19   : > { %p41_p7 = scmp.ge.s32.totalorder %s39_s14, 2  ;;  %p55_p8 = scmp.ne.s32.totalorder %s1369_s23, %s1365_s22 }
  0x1a   : > { %1003 = dma.hbm_to_vmem [thread:$0]  (!%p1476_p5), %s227_s30, 512, %s229_s9, [#allocation9], %s1690_s11, %s1690_s11, %s1692_s12  }
  0x1b   : > { %p56_p9 = scmp.eq.s32.totalorder %s1381_s26, 0  ;;  %p61_p10 = scmp.ne.s32.totalorder %s1365_s22, %s1361_s21 }
  0x1c   : > { %s1735_s14 = smov (%p41_p7, %s39_s14), 0  ;;  %p202_p13 = scmp.eq.s32.totalorder %s1460_s27, 1 }
  0x1d   : > { %1711 = sst [smem:[#allocation22_spill]] %s1735_s14  ;;  %p1496_p11 = por %p56_p9, %p55_p8 }
  0x1e   : > { %p1502_p12 = por %p62_p1, %p61_p10  ;;  %s43_s18 = ssub.s32 %s1377_s25, %s1735_s14 }
  0x1f   : > { %p46_p0 = scmp.eq.s32.totalorder %s43_s18, 0  ;;  %p208_p2 = scmp.eq.s32.totalorder %s941_s13, 1 }
  0x20   : > { %p1509_p4 = por %p202_p13, %p55_p8  ;;  %p1027_p7 = scmp.lt.s32.totalorder %s1381_s26, 2 }
  0x21   : > { %s1515_s20 = scalar_select %p46_p0, %s1369_s23, %s48_s15  }
  0x22   : > { %p1517_p9 = por %p208_p2, %p61_p10  ;;  %s1694_s29 = sand.u32 1, %s1369_s23  }
  0x23   : > { %1715 = sst [smem:[#allocation23_spill]] %s1515_s20  ;;  %s1524_s30 = sshll.u32 %s1694_s29, 3 }
  0x24   : > { %s1716_s28 = scalar_select %p1517_p9, 1, 0 }
  0x25   : > { %s1527_s8 = sshll.u32 %s1377_s25, 3  ;;  %p1531_p8 = pnand %p1027_p7, %p1496_p11 }
  0x26   : > { %1717 = sst [smem:[#allocation24_spill]] %s1716_s28  ;;  %s290_s13 = sand.u32 1, %s1381_s26  }
  0x27   : > { %s1719_s1 = sld [smem:[#allocation25_spill]]  ;;  %s294_s3 = scalar_lea.vmem [#allocation5], %s1524_s30 }
  0x28   : > { %s302_s29 = sshll.u32 %s294_s3, 4  ;;  %s1541_s16 = scalar_lea.sflag [#allocation6], %s290_s13  ;;  %s303_s29 = int_to_ptr.vmem [resolvable:$true] %s302_s29 }
  0x29   : > { %s1720_s4 = sld [smem:[#allocation27_spill]]  ;;  %s1386_s15 = smov [#allocation10]  }
  0x2a   : > { %s1721_s5 = sld [smem:[#allocation28_spill]]  ;;  %s1722_s13 = smov 8  }
  0x2b   : > { %s1723_s26 = smov 128   ;;  %s1387_s25 = smov [#allocation11]  }
  0x2c   : > { %s274_s3 = scalar_lea.vmem [#allocation2], %s1524_s30  ;;  %s313_s28 = scalar_lea.vmem [#allocation7], %s1524_s30 }
  0x2d   : > { %s298_s11 = scalar_lea.hbm %s1719_s1, %s1527_s8  ;;  %s283_s18 = sshll.u32 %s274_s3, 4  ;;  %s284_s18 = int_to_ptr.vmem [resolvable:$true] %s283_s18 }
  0x2e   : > { %s300_s12 = sshll.u32 %s298_s11, 4  ;;  %s242_s11 = sshll.u32 %s1386_s15, 4  ;;  %s301_s12 = int_to_ptr.hbm [resolvable:$true] %s300_s12  ;;  %s243_s11 = int_to_ptr.vmem [resolvable:$true] %s242_s11 }
  0x2f   : > { %1016 = dma.hbm_to_vmem [thread:$0]  (!%p1531_p8), %s301_s12, 128, %s303_s29, %s1541_s16  }
  0x30   : > { %s240_s20 = sshll.u32 %s1720_s4, 4  ;;  %s254_s1 = sshll.u32 %s1721_s5, 4  ;;  %s241_s20 = int_to_ptr.hbm [resolvable:$true] %s240_s20  ;;  %s255_s1 = int_to_ptr.hbm [resolvable:$true] %s254_s1 }
  0x31   : > { %1006 = dma.hbm_to_vmem [thread:$0]  (!%p1476_p5), %s241_s20, 512, %s243_s11, [#allocation9], %s1723_s26, %s1723_s26, %s1722_s13  }
  0x32   : > { %s256_s12 = sshll.u32 %s1387_s25, 4  ;;  %s279_s15 = scalar_lea.hbm %s1683_s0, %s1527_s8  ;;  %s257_s12 = int_to_ptr.vmem [resolvable:$true] %s256_s12 }
  0x33   : > { %1009 = dma.hbm_to_vmem [thread:$0]  (!%p1476_p5), %s255_s1, 512, %s257_s12, [#allocation12], %s1723_s26, %s1723_s26, %s1722_s13  }
  0x34   : > { %s281_s4 = sshll.u32 %s279_s15, 4  ;;  %s1724_s20 = sand.u32 1, %s1369_s23   ;;  %s282_s4 = int_to_ptr.hbm [resolvable:$true] %s281_s4 }
  0x35   : > { %s271_s11 = scalar_lea.sflag [#allocation3], %s1724_s20  ;;  %s317_s5 = scalar_lea.hbm %s1685_s2, %s1527_s8 }
  0x36   : > { %1013 = dma.hbm_to_vmem [thread:$0]  (!%p1531_p8), %s282_s4, 128, %s284_s18, %s271_s11  }
  0x37   : > { %s321_s21 = sshll.u32 %s313_s28, 4  ;;  %s319_s1 = sshll.u32 %s317_s5, 4  ;;  %s322_s21 = int_to_ptr.vmem [resolvable:$true] %s321_s21  ;;  %s320_s1 = int_to_ptr.hbm [resolvable:$true] %s319_s1 }
  0x38   : > { %1019 = dma.hbm_to_vmem [thread:$0]  (!%p1531_p8), %s320_s1, 128, %s322_s21, %s1541_s16  }
  0x39   : > { %330 = sbr.rel (%p1468_p3) target bundleno = 970 (0x3ca), region = 44  ;;  %s1582_s26 = sand.u32 (!%p1468_p3), 1, %s1365_s22  }
  0x3a   : > { %s1585_s4 = sshll.u32 (!%p1468_p3), %s1582_s26, 3  ;;  %s333_s8 = scalar_lea.sflag (!%p1468_p3), [#allocation3], %s1582_s26 }
  0x3b   : > { %s336_s30 = scalar_lea.vmem (!%p1468_p3), [#allocation2], %s1585_s4 }
  0x3e   : > { %1340 = dma.done.wait (%p1502_p12), %s333_s8, 128  }
  0x3f   : > { %1342 = vsyncadd (%p1502_p12), %s333_s8, 4294967168  ;;  %s342_s5 = sand.u32 1, %s1460_s27   ;;  %s346_s7 = scalar_lea.vmem [#allocation5], %s1585_s4 }
  0x40   : > { %s343_s21 = scalar_lea.sflag [#allocation6], %s342_s5 }
  0x41   : > { %1344 = dma.done.wait (%p1502_p12), %s343_s21, 256  }
  0x42   : > { %1346 = vsyncadd (%p1502_p12), %s343_s21, 4294967040  ;;  %s356_s28 = scalar_lea.vmem [#allocation7], %s1585_s4 }
  0x43   : > { %1348 = dma.done.wait (%p62_p1), [#allocation9], 1024  }
  0x44   : > { %1350 = vsyncadd (%p62_p1), [#allocation9], 4294966272 }
  0x45   : > { %1352 = dma.done.wait (%p62_p1), [#allocation12], 512  }
  0x46   : > { %1354 = vsyncadd (%p62_p1), [#allocation12], 4294966784  ;;  %v444_v0 = vld [vmem:[#allocation10 + $0x18] sm:$0xff]  ;;  %v443_v1 = vld [vmem:[#allocation10 + $0x10] sm:$0xff]  ;;  %vm416_vm0 = vcmask 261120   ;;  %vm496_vm1 = vcmask 64512  }
  0x47   : > { %v415_v2 = vld [vmem:[#allocation8 + $0x18] sm:$0xff]  ;;  %460 = vmatpush.msra.mxu1 %v444_v0  ;;  %v414_v3 = vld [vmem:[#allocation8 + $0x10] sm:$0xff]  ;;  %v442_v4 = vld [vmem:[#allocation10 + $0x8] sm:$0xff]  ;;  %s1388_s27 = smov 104   ;;  %s1389_s17 = smov 120   ;;  %vm766_vm2 = vcmask 130048  }
  0x48   : > { %432 = vmatpush.msra.mxu0 %v415_v2  ;;  %v413_v5 = vld [vmem:[#allocation8 + $0x8] sm:$0xff]  ;;  %v441_v6 = vld [vmem:[#allocation10] sm:$0xff]  ;;  %v411_v9 = vld [vmem:[%s336_s30] sm:$0xff]  ;;  %s1390_s9 = smov 112   ;;  %s1391_s16 = smov 16   ;;  %vm768_vm3 = vcmask 195584  }
  0x49   : > { %461 = vmatpush.msra.mxu1 %v443_v1  ;;  %v412_v7 = vld [vmem:[#allocation8] sm:$0xff]  ;;  %v472_v12 = vld [vmem:[#allocation11 + $0x18] sm:$0xff]  ;;  %v471_v13 = vld [vmem:[#allocation11 + $0x10] sm:$0xff]  ;;  %s1392_s13 = smov 8   ;;  %s1393_s12 = smov 24  }
  0x4a   : > { %433 = vmatpush.msra.mxu0 %v414_v3  ;;  %v440_v8 = vld [vmem:[%s346_s7] sm:$0xff]  ;;  %488 = vmatpush.msra.mxu2 %v472_v12  ;;  %v468_v16 = vld [vmem:[%s356_s28] sm:$0xff]  ;;  %s977_s14 = sshll.u32 %s1373_s24, 3  ;;  %s410_s18 = scalar_lea.vmem [#allocation13], %s1585_s4 }
  0x4b   : > { %462 = vmatpush.msra.mxu1 %v442_v4  ;;  %v470_v14 = vld [vmem:[#allocation11 + $0x8] sm:$0xff]  ;;  %v469_v15 = vld [vmem:[#allocation11] sm:$0xff]  ;;  %s783_s3 = scalar_lea.hbm %s1689_s6, %s977_s14  ;;  %s785_s20 = sshll.u32 %s410_s18, 4  ;;  %s786_s20 = int_to_ptr.vmem [resolvable:$true] %s785_s20 }
  0x4c   : > { %434 = vmatpush.msra.mxu0 %v413_v5  ;;  %489 = vmatpush.msra.mxu2 %v471_v13  ;;  %s787_s11 = sshll.u32 %s783_s3, 4  ;;  %s772_s24 = scalar_lea.sflag [#allocation4], %s1582_s26  ;;  %s788_s11 = int_to_ptr.hbm [resolvable:$true] %s787_s11 }
  0x4d   : > { %463 = vmatpush.msra.mxu1 %v441_v6  ;;  %s1301_s10 = sshra.s32 %s788_s11, 4  ;;  %s1307_s8 = scalar_lea.hbm %s1689_s6, 16  ;;  %s1302_s10 = int_to_ptr.hbm [resolvable:$true] %s1301_s10 }
  0x4e   : > { %435 = vmatpush.msra.mxu0 %v412_v7  ;;  %962 = vmatmul.msk.f32.vlgmr.msra.gmra.mxu1 %vm416_vm0, %v440_v8  ;;  %s1303_s25 = scalar_lea.hbm %s1302_s10, 8  ;;  %p1308_p10 = scmp.lt.s32.totalorder %s1302_s10, %s1689_s6 }
  0x4f   : > { %961 = vmatmul.msk.f32.vlgmr.msra.gmra.mxu0 %vm416_vm0, %v411_v9  ;;  %490 = vmatpush.msra.mxu2 %v470_v14  ;;  %p1304_p1 = scmp.ne.s32.totalorder %s1302_s10, %s1303_s25  ;;  %p1309_p11 = scmp.lt.s32.totalorder %s1307_s8, %s1303_s25 }
  0x51   : > { %491 = vmatpush.msra.mxu2 %v469_v15  ;;  %p1305_p3 = pnand %p1304_p1, %p1509_p4  ;;  %p1310_p12 = por %p1309_p11, %p1308_p10 }
  0x52   : > { %963 = vmatmul.msk.f32.vlgmr.msra.gmra.mxu2 %vm416_vm0, %v468_v16 }
  0x53   : > { %p1306_p5 = pneg %p1305_p3 }
  0x55   : > { %p1311_p13 = pnand %p1310_p12, %p1306_p5 }
  0xcb   : > { %v465_v10 = vpop.f32.mrf.mxu1 }
  0xcc   : > { %690 = vrot.lane.b32.xlu2 %v465_v10, %s1388_s27  ;;  %559 = vrot.lane.b32.xlu1 %v465_v10, %s1389_s17  ;;  %v437_v11 = vpop.f32.mrf.mxu0 }
  0xcd   : > { %625 = vrot.lane.b32.xlu0 %v465_v10, %s1390_s9  ;;  %964 = vmatpush.xpose.msk.msra.mxu3 %vm496_vm1, %v465_v10 }
  0xd0   : > { %965 = vmatmul.msk.f32.vlgmr.msra.gmra.mxu3 %vm496_vm1, %v437_v11 }
  0xd4   : > { %688 = vrot.lane.b32.xlu2 %v437_v11, %s1388_s27  ;;  %557 = vrot.lane.b32.xlu1 %v437_v11, %s1389_s17 }
  0xd5   : > { %623 = vrot.lane.b32.xlu0 %v437_v11, %s1390_s9  ;;  %v493_v25 = vpop.f32.mrf.mxu2 }
  0xd6   : > { %552 = vmatpush.msrb.mxu3 %v493_v25 }
 0x126   : > { %v691_v18 = vpop.permute.xlu2 %690 }
 0x12e   : > { %v689_v22 = vpop.permute.xlu2 %688 }
 0x13e   : > { %v560_v17 = vpop.permute.xlu1 %559 }
 0x13f   : > { %v626_v19 = vpop.permute.xlu0 %625  ;;  %967 = vmatpush.xpose.msk.msrb.mxu0 %vm496_vm1, %v560_v17 }
 0x140   : > { %970 = vmatpush.xpose.msk.msrb.mxu2 %vm496_vm1, %v626_v19 }
 0x143   : > { %973 = vmatpush.xpose.msk.msra.mxu0 %vm496_vm1, %v691_v18 }
 0x146   : > { %v558_v20 = vpop.permute.xlu1 %557 }
 0x147   : > { %v624_v21 = vpop.permute.xlu0 %623  ;;  %968 = vmatmul.msk.f32.vlgmr.msrb.gmra.mxu0 %vm496_vm1, %v558_v20 }
 0x148   : > { %971 = vmatmul.msk.f32.vlgmr.msrb.gmra.mxu2 %vm496_vm1, %v624_v21 }
 0x14f   : > { %974 = vmatmul.msk.f32.vlgmr.msra.gmra.mxu0 %vm496_vm1, %v689_v22 }
 0x153   : > { %v520_v23 = vpop.f32.mrf.mxu3 }
 0x154   : > { %v523_v24 = vsel %vm496_vm1, %v520_v23, -inf }
 0x155   : > { %524 = vmax.xlane.f32.xlu0 %v523_v24 }
 0x1c4   : > { %v582_v26 = vpop.f32.mrf.mxu0 }
 0x1c5   : > { %v585_v27 = vsel %vm496_vm1, %v582_v26, -inf }
 0x1c6   : > { %586 = vmax.xlane.f32.xlu1 %v585_v27 }
 0x1c8   : > { %v525_v28 = vpop.xlane.xlu0 %524 }
 0x1c9   : > { %v526_v29 = vsub.f32 %v520_v23, %v525_v28 }
 0x1cb   : > { %v527_v30 = vmul.f32 1.442695, %v526_v29  ;;  %v648_v31 = vpop.f32.mrf.mxu2 }
 0x1cc   : > { %v651_v32 = vsel %vm496_vm1, %v648_v31, -inf  ;;  %v713_v33 = vpop.f32.mrf.mxu0 }
 0x1cd   : > { %1091 = vpow2.f32 %v527_v30  ;;  %652 = vmax.xlane.f32.xlu2 %v651_v32  ;;  %v716_v35 = vsel %vm496_vm1, %v713_v33, -inf }
 0x1d3   : > { %v1092_v34 = vpop.eup %1091 }
 0x1d4   : > { %v529_v36 = vsel %vm496_vm1, %v1092_v34, 0.0 }
 0x1d5   : > { %717 = vmax.xlane.f32.xlu2 %v716_v35  ;;  %530 = vadd.xlane.f32.xlu0 %v529_v36 }
 0x239   : > { %v587_v37 = vpop.xlane.xlu1 %586 }
 0x23a   : > { %v588_v38 = vsub.f32 %v582_v26, %v587_v37 }
 0x23c   : > { %v589_v39 = vmul.f32 1.442695, %v588_v38 }
 0x23e   : > { %1093 = vpow2.f32 %v589_v39 }
 0x240   : > { %v653_v40 = vpop.xlane.xlu2 %652 }
 0x241   : > { %v654_v41 = vsub.f32 %v648_v31, %v653_v40 }
 0x243   : > { %v655_v42 = vmul.f32 1.442695, %v654_v41 }
 0x244   : > { %v1094_v43 = vpop.eup %1093 }
 0x245   : > { %1095 = vpow2.f32 %v655_v42  ;;  %v591_v44 = vsel %vm496_vm1, %v1094_v43, 0.0 }
 0x246   : > { %592 = vadd.xlane.f32.xlu1 %v591_v44 }
 0x248   : > { %v718_v45 = vpop.xlane.xlu2 %717  ;;  %v531_v46 = vpop.xlane.xlu0 %530 }
 0x249   : > { %v719_v47 = vsub.f32 %v713_v33, %v718_v45  ;;  %1097 = vrcp.f32 %v531_v46 }
 0x24b   : > { %v1096_v48 = vpop.eup %1095  ;;  %v720_v49 = vmul.f32 1.442695, %v719_v47 }
 0x24c   : > { %v657_v50 = vsel %vm496_vm1, %v1096_v48, 0.0 }
 0x24d   : > { %1099 = vpow2.f32 %v720_v49  ;;  %658 = vadd.xlane.f32.xlu2 %v657_v50 }
 0x24f   : > { %v1098_v51 = vpop.eup %1097 }
 0x250   : > { %v533_v52 = vmul.f32 %v1098_v51, %v1092_v34 }
 0x252   : > { %966 = vmatmul.msk.f32.vlgmr.msrb.gmra.mxu3 %vm496_vm1, %v533_v52 }
 0x253   : > { %v1100_v53 = vpop.eup %1099 }
 0x254   : > { %v722_v54 = vsel %vm496_vm1, %v1100_v53, 0.0 }
 0x255   : > { %723 = vadd.xlane.f32.xlu0 %v722_v54 }
 0x25f   : > { %597 = vrot.lane.b32.xlu1 %v493_v25, %s1389_s17 }
 0x265   : > { %662 = vrot.lane.b32.xlu2 %v493_v25, %s1390_s9 }
 0x269   : > { %727 = vrot.lane.b32.xlu0 %v493_v25, %s1388_s27 }
 0x2b9   : > { %v593_v56 = vpop.xlane.xlu1 %592 }
 0x2c0   : > { %v659_v55 = vpop.xlane.xlu2 %658 }
 0x2c1   : > { %1101 = vrcp.f32 %v659_v55 }
 0x2c2   : > { %1103 = vrcp.f32 %v593_v56 }
 0x2c7   : > { %v1102_v57 = vpop.eup %1101 }
 0x2c8   : > { %v661_v58 = vmul.f32 %v1102_v57, %v1096_v48  ;;  %v663_v59 = vpop.permute.xlu2 %662  ;;  %v1104_v60 = vpop.eup %1103 }
 0x2c9   : > { %683 = vmatpush.msra.mxu3 %v663_v59  ;;  %v724_v61 = vpop.xlane.xlu0 %723  ;;  %v595_v63 = vmul.f32 %v1104_v60, %v1094_v43 }
 0x2ca   : > { %972 = vmatmul.msk.f32.vlgmr.msra.gmra.mxu3 %vm496_vm1, %v661_v58  ;;  %1105 = vrcp.f32 %v724_v61 }
 0x2d0   : > { %v1106_v0 = vpop.eup %1105 }
 0x2d1   : > { %v598_v62 = vpop.permute.xlu1 %597  ;;  %v726_v1 = vmul.f32 %v1106_v0, %v1100_v53 }
 0x2d2   : > { %618 = vmatpush.msrb.mxu1 %v598_v62 }
 0x2d3   : > { %969 = vmatmul.msk.f32.vlgmr.msrb.gmra.mxu1 %vm496_vm1, %v595_v63 }
 0x2d5   : > { %v554_v3 = vpop.f32.mrf.mxu3 }
 0x2db   : > { %v728_v2 = vpop.permute.xlu0 %727 }
 0x2dc   : > { %748 = vmatpush.msra.mxu1 %v728_v2 }
 0x2dd   : > { %975 = vmatmul.msk.f32.vlgmr.msra.gmra.mxu1 %vm496_vm1, %v726_v1 }
 0x34d   : > { %v685_v4 = vpop.f32.mrf.mxu3 }
 0x34e   : > { %758 = vrot.lane.b32.xlu0 %v685_v4, %s1391_s16 }
 0x350   : > { %v620_v5 = vpop.f32.mrf.mxu1 }
 0x351   : > { %754 = vrot.lane.b32.xlu1 %v620_v5, %s1392_s13 }
 0x35a   : > { %v750_v6 = vpop.f32.mrf.mxu1 }
 0x35b   : > { %762 = vrot.lane.b32.xlu2 %v750_v6, %s1393_s12 }
 0x3b5   : > { %v763_v10 = vpop.permute.xlu2 %762 }
 0x3c0   : > { %v759_v8 = vpop.permute.xlu0 %758 }
 0x3c3   : > { %v755_v7 = vpop.permute.xlu1 %754 }
 0x3c4   : > { %v765_v9 = vsel %vm496_vm1, %v554_v3, %v755_v7 }
 0x3c5   : > { %v767_v11 = vsel %vm766_vm2, %v765_v9, %v759_v8 }
 0x3c6   : > { %v769_v12 = vsel %vm768_vm3, %v767_v11, %v763_v10 }
 0x3c7   : > { %770 = vst.msk [vmem:[%s410_s18] sm:$0xff] %vm416_vm0, %v769_v12 }
 0x3c8   : > { %1314 = shalt.err (!%p1311_p13)
}
 0x3c9   : > { %998 = dma.vmem_to_hbm [thread:$0]  (%p1509_p4), %s786_s20, 128, %s788_s11, %s772_s24  }
 0x3ca PF: > { %s1725_s26 = sld [smem:[#allocation19_spill]]  ;;  %p1021_p0 = pnand %p946_p6, %p1517_p9 }
 0x3cb   : > { %s1727_s7 = sld [smem:[#allocation21_spill]] }
 0x3cc   : > { %p1022_p2 = pneg %p1021_p0 }
 0x3d0   : > { %s799_s28 = sand.u32 1, %s1725_s26  }
 0x3d1   : > { %s800_s27 = scalar_lea.sflag [#allocation4], %s799_s28 }
 0x3d2   : > { %1356 = dma.done.wait (%p1022_p2), %s800_s27, 128  }
 0x3d3   : > { %1358 = vsyncadd (%p1022_p2), %s800_s27, 4294967168  ;;  %s27_s26 = sadd.s32 1, %s1727_s7   ;;  %s1728_s17 = sld [smem:[#allocation23_spill]] }
 0x3d4   : > { %p24_p7 = scmp.ge.s32.totalorder %s27_s26, 4   ;;  %s1729_s24 = sld [smem:[#allocation20_spill]] }
 0x3d5   : > { %s1730_s25 = sld [smem:[#allocation22_spill]]  ;;  %s1731_s21 = smov %s1365_s22 }
 0x3d6   : > { %s1732_s22 = smov %s1369_s23  ;;  %26 = sbr.rel (!%p24_p7) target bundleno = 15 (0xf), region = 125 }
 0x3d9   : > { %s1733_s23 = smov %s1728_s17 }
 0x3db   :  { %806 = vsyncpa [#allocation3], 1 }
 0x3dc   :  { %808 = vsyncpa [#allocation3 + $0x1], 1 }
 0x3dd   :  { %809 = vsyncpa [#allocation6], 1 }
 0x3de   :  { %811 = vsyncpa [#allocation6 + $0x1], 1 }
 0x3df   :  { %812 = vsyncpa [#allocation9], 1 }
 0x3e0   :  { %813 = vsyncpa [#allocation12], 1 }
 0x3e1   :  { %814 = vsyncpa [#allocation4], 1 }
 0x3e2   :  { %816 = vsyncpa [#allocation4 + $0x1], 1 }

</bundles_post_ra>
